<compile_context>
chip_gen: v5e
topology: v5e:2x2
jax: 0.10.0
libtpu: 0.0.40
codegen_flags: <defaults>
</compile_context>

<pallas_src>
import functools

import jax
import jax.numpy as jnp
from jax.experimental import pallas as pl
from jax.experimental.pallas import tpu as pltpu


def _round_up(a, b):
    return (a + b - 1) // b * b


# --------------------------------------------------------------------------- #
# Kernel
# --------------------------------------------------------------------------- #
def fin_kernel(x_ref, ws_ref, wq_ref, bsum_ref, wlin_ref,
               w1x_ref, w1fm_ref, b1_ref, w2_ref, b2_ref, out_ref):
    """Fused banded-FM + field-linear + prediction MLP for FIN.

    x_ref    : (TM, NH0P)  f32    padded, batch tile
    ws_ref   : (NH0P, CEP)        banded FM factors           (matmul dtype)
    wq_ref   : (NH0P, CEP)        banded squared FM factors   (matmul dtype)
    bsum_ref : (CEP, CP)          block-diagonal 0/1 channel-sum matrix
    wlin_ref : (NH0P, CP)         banded field-size linear (bias folded into b1)
    w1x_ref  : (NH0P, HP)         first MLP layer, x part
    w1fm_ref : (CP, HP)           first MLP layer, x_fm part
    b1_ref   : (1, HP)   f32      first MLP bias (+ folded lin_b term)
    w2_ref   : (HP, 128)          second MLP layer (real weights in column 0)
    b2_ref   : (1, 128)  f32      second MLP bias (real bias in column 0)
    out_ref  : (TM, 128) f32      sigmoid(pred) in column 0
    """
    x = x_ref[...]                                   # f32 elementwise path
    md = ws_ref.dtype
    xb = x.astype(md)
    xsq = (x * x).astype(md)

    # Sliding-window FM, all channels at once via banded matmuls.
    s = jnp.dot(xb, ws_ref[...], preferred_element_type=jnp.float32)    # (TM, CEP)
    q = jnp.dot(xsq, wq_ref[...], preferred_element_type=jnp.float32)   # (TM, CEP)
    d = s * s - q                                                        # f32, VPU
    # Per-channel sum over the embedding lanes via one MXU matmul.
    fm = 0.5 * jnp.dot(d.astype(bsum_ref.dtype), bsum_ref[...],
                       preferred_element_type=jnp.float32)               # (TM, CP)
    # Banded field-size linear (lin bias folded into b1 in the wrapper).
    lin = jnp.dot(xb, wlin_ref[...], preferred_element_type=jnp.float32)
    x_fm = fm + lin                                                      # (TM, CP)

    # Prediction MLP; w1 split so no lane concatenate of [x, x_fm] is needed.
    h = (jnp.dot(xb, w1x_ref[...], preferred_element_type=jnp.float32)
         + jnp.dot(x_fm.astype(w1fm_ref.dtype), w1fm_ref[...],
                   preferred_element_type=jnp.float32)
         + b1_ref[...])
    h = jnp.where(h > 0, h, 0.01 * h)                                    # leaky_relu
    o = (jnp.dot(h.astype(w2_ref.dtype), w2_ref[...],
                 preferred_element_type=jnp.float32)
         + b2_ref[...])
    out_ref[...] = jax.nn.sigmoid(o)


# --------------------------------------------------------------------------- #
# Wrapper: banded / padded parameter construction + pallas_call
# --------------------------------------------------------------------------- #
def build_fin_params(nh0, v, lin_w, lin_b, w1, b1, w2, b2, *, lane=128):
    """Precompute lane-dense banded weight slabs (f32)."""
    channel, field_size, n_emb = v.shape
    d_hid = w1.shape[1]
    nh0_p = _round_up(nh0, lane)
    c_p = _round_up(channel, lane)
    ce_p = _round_up(channel * n_emb, lane)
    h_p = _round_up(d_hid, lane)
    f32 = jnp.float32

    ws = jnp.zeros((nh0_p, ce_p), f32)
    wlin = jnp.zeros((nh0_p, c_p), f32)
    bsum = jnp.zeros((ce_p, c_p), f32)
    for c in range(channel):                                   # trace-time loop
        ws = ws.at[c:c + field_size, c * n_emb:(c + 1) * n_emb].set(v[c])
        wlin = wlin.at[c:c + field_size, c].set(lin_w[:, 0])
        bsum = bsum.at[c * n_emb:(c + 1) * n_emb, c].set(1.0)
    wq = ws * ws

    w1x = jnp.zeros((nh0_p, h_p), f32).at[:nh0, :d_hid].set(w1[:nh0])
    w1fm = jnp.zeros((c_p, h_p), f32).at[:channel, :d_hid].set(w1[nh0:])
    # lin_b is added to every unfolded window; fold its contribution
    # (lin_b * ones(1, channel) @ w1_fm) into the first MLP bias.
    b1_eff = jnp.zeros((1, h_p), f32).at[:, :d_hid].set(
        b1.reshape(1, d_hid) + lin_b.reshape(()) * jnp.sum(w1[nh0:], axis=0))
    w2p = jnp.zeros((h_p, lane), f32).at[:d_hid, 0].set(w2[:, 0])
    b2p = jnp.zeros((1, lane), f32).at[0, 0].set(b2.reshape(()))

    return dict(ws=ws, wq=wq, bsum=bsum, wlin=wlin, w1x=w1x, w1fm=w1fm,
                b1=b1_eff, w2=w2p, b2=b2p, nh0=nh0, nh0_p=nh0_p, out_p=lane)


def fin_forward(x, params, *, matmul_dtype=jnp.bfloat16):
    n = x.shape[0]
    nh0, nh0_p, out_p = params['nh0'], params['nh0_p'], params['out_p']
    ce_p = params['ws'].shape[1]
    c_p = params['wlin'].shape[1]
    h_p = params['w1x'].shape[1]

    tm = 256 if n >= 256 else _round_up(max(n, 1), 8)
    n_p = _round_up(n, tm)
    xp = jnp.zeros((n_p, nh0_p), jnp.float32).at[:n, :nh0].set(x)

    md = matmul_dtype
    ws = params['ws'].astype(md)
    wq = params['wq'].astype(md)
    bsum = params['bsum'].astype(md)
    wlin = params['wlin'].astype(md)
    w1x = params['w1x'].astype(md)
    w1fm = params['w1fm'].astype(md)
    w2p = params['w2'].astype(md)
    b1 = params['b1']                       # f32 (added after accumulation)
    b2 = params['b2']                       # f32

    def resident(a):                        # weights: same block every grid step
        return pl.BlockSpec(a.shape, lambda i: (0, 0))

    weights = (ws, wq, bsum, wlin, w1x, w1fm, b1, w2p, b2)
    flops = 2 * n_p * (2 * nh0_p * ce_p + ce_p * c_p + nh0_p * c_p
                       + nh0_p * h_p + c_p * h_p + h_p * out_p)
    bytes_accessed = int(xp.size * 4 + n_p * out_p * 4
                         + sum(int(a.size) * a.dtype.itemsize for a in weights))

    out = pl.pallas_call(
        fin_kernel,
        out_shape=jax.ShapeDtypeStruct((n_p, out_p), jnp.float32),
        grid=(n_p // tm,),
        in_specs=[pl.BlockSpec((tm, nh0_p), lambda i: (i, 0))]
                 + [resident(a) for a in weights],
        out_specs=pl.BlockSpec((tm, out_p), lambda i: (i, 0)),
        compiler_params=pltpu.CompilerParams(
            dimension_semantics=("parallel",)),
        cost_estimate=pl.CostEstimate(flops=flops,
                                      transcendentals=n_p * out_p,
                                      bytes_accessed=bytes_accessed),
    )(xp, *weights)
    return out[:n, 0:1]


# --------------------------------------------------------------------------- #
# Pure-JAX references (for correctness verification of the banded layout)
# --------------------------------------------------------------------------- #
def fin_reference(x, v, lin_w, lin_b, w1, b1, w2, b2):
    """Direct per-window (F.unfold) f32 reference of FIN.forward."""
    channel, field_size, _ = v.shape
    hi = jax.lax.Precision.HIGHEST
    cols = []
    for c in range(channel):
        win = x[:, c:c + field_size]
        s = jnp.dot(win, v[c], precision=hi)
        q = jnp.dot(win * win, v[c] * v[c], precision=hi)
        fm_c = 0.5 * jnp.sum(s * s - q, axis=-1, keepdims=True)
        lin_c = jnp.dot(win, lin_w, precision=hi) + lin_b
        cols.append(fm_c + lin_c)
    x_fm = jnp.concatenate(cols, axis=-1)
    res = jnp.concatenate([x, x_fm], axis=-1)
    h = jnp.dot(res, w1, precision=hi) + b1
    h = jnp.where(h > 0, h, 0.01 * h)
    o = jnp.dot(h, w2, precision=hi) + b2
    return jax.nn.sigmoid(o)


def fin_banded_reference(x, params, matmul_dtype=jnp.float32):
    """Pure-JAX mirror of the kernel math (validates band layout / bias fold)."""
    n = x.shape[0]
    nh0, nh0_p = params['nh0'], params['nh0_p']
    xp = jnp.zeros((n, nh0_p), jnp.float32).at[:, :nh0].set(x)
    hi = jax.lax.Precision.HIGHEST
    md = matmul_dtype

    def dot(a, b):
        return jnp.dot(a.astype(md), b.astype(md),
                       preferred_element_type=jnp.float32, precision=hi)

    s = dot(xp, params['ws'])
    q = dot(xp * xp, params['wq'])
    d = s * s - q
    fm = 0.5 * dot(d, params['bsum'])
    x_fm = fm + dot(xp, params['wlin'])
    h = dot(xp, params['w1x']) + dot(x_fm, params['w1fm']) + params['b1']
    h = jnp.where(h > 0, h, 0.01 * h)
    o = dot(h, params['w2']) + params['b2']
    return jax.nn.sigmoid(o)[:, 0:1]


# --------------------------------------------------------------------------- #
if __name__ == "__main__":
    # ---- small hyper-parameters consistent with FIN.__init__ ----
    batch = 10                        # rows in data (sliced to num_targets)
    n_discrete_features = 16
    n_continous_features_total = 12   # args.n_continous_features (multiple of 3)
    n_cont = n_continous_features_total // 3
    n_channels_c = 4
    n_users = 8                       # args.num_targets
    field_size = 8
    n_embedding = 10
    nh0 = n_discrete_features - 6 + 3 * n_channels_c    # 22
    channel = nh0 - field_size + 1                       # 15
    d_in = nh0 + channel                                 # 37
    d_hid = d_in // 2                                    # 18

    key = jax.random.PRNGKey(0)
    ks = jax.random.split(key, 12)

    discrete_x = jax.random.normal(ks[0], (batch, n_discrete_features), jnp.float32)
    continous_x = jax.random.normal(ks[1], (batch, n_continous_features_total), jnp.float32)

    def glorot(k, shape):
        lim = (6.0 / (shape[-2] + shape[-1])) ** 0.5
        return jax.random.uniform(k, shape, jnp.float32, -lim, lim)

    # TODO(synk): DiscreteFeatureEmbeddingLayer / ContinousFeatureEmbeddingLayer /
    # PredictionLayer sources are not in the provided module; they are approximated
    # as deterministic linear embeddings and a [d_in -> d_hid -> 1] MLP.
    W_d = glorot(ks[2], (n_discrete_features, n_discrete_features - 6))
    W_c = glorot(ks[3], (n_cont, n_channels_c))
    b_c = jnp.zeros((n_channels_c,), jnp.float32)

    v = glorot(ks[4], (channel, field_size, n_embedding))   # nn.Parameter(1,C,F,E) squeezed
    lin_w = glorot(ks[5], (field_size, 1))                   # nn.Linear(field_size, 1)
    lin_b = 0.1 * jax.random.normal(ks[8], (1, 1), jnp.float32)
    w1 = glorot(ks[6], (d_in, d_hid))
    b1 = 0.1 * jax.random.normal(ks[9], (1, d_hid), jnp.float32)
    w2 = glorot(ks[7], (d_hid, 1))
    b2 = 0.05 * jax.random.normal(ks[10], (1, 1), jnp.float32)

    # ---- glue (plain JAX): slice to n_users, embed, concat ----
    xd = discrete_x[:n_users]
    xc = continous_x[:n_users]
    x_d = xd @ W_d                                                        # (n_users, nh0-3C)
    x_c = (xc.reshape(n_users, 3, n_cont) @ W_c + b_c).reshape(n_users, 3 * n_channels_c)
    x = jnp.concatenate([x_d, x_c], axis=-1)                              # (n_users, nh0)

    # ---- correctness of the banded restructuring (pure JAX, f32, exact) ----
    ref = fin_reference(x, v, lin_w, lin_b, w1, b1, w2, b2)
    params = build_fin_params(nh0, v, lin_w, lin_b, w1, b1, w2, b2)
    band_f32 = fin_banded_reference(x, params, jnp.float32)
    assert bool(jnp.allclose(band_f32, ref, atol=1e-4, rtol=1e-4)), \
        "banded-weight layout mismatch vs unfold reference"

    # ---- run the Pallas kernel (bf16 matmul operands, f32 accumulation) ----
    pred = fin_forward(x, params, matmul_dtype=jnp.bfloat16)
    pred = jax.block_until_ready(pred)

    band_bf16 = fin_banded_reference(x, params, jnp.bfloat16)   # matched-precision ref
    assert pred.shape == (n_users, 1), pred.shape
    assert bool(jnp.all(jnp.isfinite(pred)))
    assert bool(jnp.all((pred >= 0.0) & (pred <= 1.0)))
    assert bool(jnp.allclose(pred, band_bf16, atol=5e-3, rtol=0.0)), \
        "kernel output mismatch vs matched-precision reference"
    print("KERNEL_OK")
</pallas_src>

<mosaic_0001>
module attributes {stable_mosaic.version = 11 : i64} {
  func.func @fin_kernel(%arg0: i32, %arg1: memref<8x128xf32, #tpu.memory_space<vmem>>, %arg2: memref<128x256xbf16, #tpu.memory_space<vmem>>, %arg3: memref<128x256xbf16, #tpu.memory_space<vmem>>, %arg4: memref<256x128xbf16, #tpu.memory_space<vmem>>, %arg5: memref<128x128xbf16, #tpu.memory_space<vmem>>, %arg6: memref<128x128xbf16, #tpu.memory_space<vmem>>, %arg7: memref<128x128xbf16, #tpu.memory_space<vmem>>, %arg8: memref<1x128xf32, #tpu.memory_space<vmem>>, %arg9: memref<128x128xbf16, #tpu.memory_space<vmem>>, %arg10: memref<1x128xf32, #tpu.memory_space<vmem>>, %arg11: memref<8x128xf32, #tpu.memory_space<vmem>>) attributes {dimension_semantics = [#tpu.dimension_semantics<parallel>], iteration_bounds = array<i64: 1>, scalar_prefetch = 0 : i64, scratch_operands = 0 : i64, tpu.core_type = #tpu.core_type<tc>, window_params = [{transform_indices = @transform_0, window_bounds = array<i64: 8, 128>}, {pipeline_mode = #tpu.pipeline_mode<synchronous>, transform_indices = @transform_1, window_bounds = array<i64: 128, 256>}, {pipeline_mode = #tpu.pipeline_mode<synchronous>, transform_indices = @transform_2, window_bounds = array<i64: 128, 256>}, {pipeline_mode = #tpu.pipeline_mode<synchronous>, transform_indices = @transform_3, window_bounds = array<i64: 256, 128>}, {pipeline_mode = #tpu.pipeline_mode<synchronous>, transform_indices = @transform_4, window_bounds = array<i64: 128, 128>}, {pipeline_mode = #tpu.pipeline_mode<synchronous>, transform_indices = @transform_5, window_bounds = array<i64: 128, 128>}, {pipeline_mode = #tpu.pipeline_mode<synchronous>, transform_indices = @transform_6, window_bounds = array<i64: 128, 128>}, {pipeline_mode = #tpu.pipeline_mode<synchronous>, transform_indices = @transform_7, window_bounds = array<i64: 1, 128>}, {pipeline_mode = #tpu.pipeline_mode<synchronous>, transform_indices = @transform_8, window_bounds = array<i64: 128, 128>}, {pipeline_mode = #tpu.pipeline_mode<synchronous>, transform_indices = @transform_9, window_bounds = array<i64: 1, 128>}, {transform_indices = @transform_10, window_bounds = array<i64: 8, 128>}]} {
    %c0 = arith.constant 0 : index
    %c0_0 = arith.constant 0 : index
    %0 = vector.load %arg1[%c0, %c0_0] : memref<8x128xf32, #tpu.memory_space<vmem>>, vector<8x128xf32>
    %1 = arith.truncf %0 : vector<8x128xf32> to vector<8x128xbf16>
    %2 = arith.mulf %0, %0 : vector<8x128xf32>
    %3 = arith.truncf %2 : vector<8x128xf32> to vector<8x128xbf16>
    %c0_1 = arith.constant 0 : index
    %c0_2 = arith.constant 0 : index
    %4 = vector.load %arg2[%c0_1, %c0_2] : memref<128x256xbf16, #tpu.memory_space<vmem>>, vector<128x256xbf16>
    %cst = arith.constant dense<0.000000e+00> : vector<8x256xf32>
    %5 = tpu.matmul %1, %4, %cst {dimension_numbers = #tpu.dot_dimension_numbers<[1], [0], [0], [1], [0, 0, 1, 1], [], []>} : vector<8x128xbf16>, vector<128x256xbf16>, vector<8x256xf32> -> vector<8x256xf32>
    %c0_3 = arith.constant 0 : index
    %c0_4 = arith.constant 0 : index
    %6 = vector.load %arg3[%c0_3, %c0_4] : memref<128x256xbf16, #tpu.memory_space<vmem>>, vector<128x256xbf16>
    %cst_5 = arith.constant dense<0.000000e+00> : vector<8x256xf32>
    %7 = tpu.matmul %3, %6, %cst_5 {dimension_numbers = #tpu.dot_dimension_numbers<[1], [0], [0], [1], [0, 0, 1, 1], [], []>} : vector<8x128xbf16>, vector<128x256xbf16>, vector<8x256xf32> -> vector<8x256xf32>
    %8 = arith.mulf %5, %5 : vector<8x256xf32>
    %9 = arith.subf %8, %7 : vector<8x256xf32>
    %10 = arith.truncf %9 : vector<8x256xf32> to vector<8x256xbf16>
    %c0_6 = arith.constant 0 : index
    %c0_7 = arith.constant 0 : index
    %11 = vector.load %arg4[%c0_6, %c0_7] : memref<256x128xbf16, #tpu.memory_space<vmem>>, vector<256x128xbf16>
    %cst_8 = arith.constant dense<0.000000e+00> : vector<8x128xf32>
    %12 = tpu.matmul %10, %11, %cst_8 {dimension_numbers = #tpu.dot_dimension_numbers<[1], [0], [0], [1], [0, 0, 1, 1], [], []>} : vector<8x256xbf16>, vector<256x128xbf16>, vector<8x128xf32> -> vector<8x128xf32>
    %cst_9 = arith.constant 5.000000e-01 : f32
    %13 = vector.broadcast %cst_9 : f32 to vector<8x128xf32>
    %14 = arith.mulf %13, %12 : vector<8x128xf32>
    %c0_10 = arith.constant 0 : index
    %c0_11 = arith.constant 0 : index
    %15 = vector.load %arg5[%c0_10, %c0_11] : memref<128x128xbf16, #tpu.memory_space<vmem>>, vector<128x128xbf16>
    %cst_12 = arith.constant dense<0.000000e+00> : vector<8x128xf32>
    %16 = tpu.matmul %1, %15, %cst_12 {dimension_numbers = #tpu.dot_dimension_numbers<[1], [0], [0], [1], [0, 0, 1, 1], [], []>} : vector<8x128xbf16>, vector<128x128xbf16>, vector<8x128xf32> -> vector<8x128xf32>
    %17 = arith.addf %14, %16 : vector<8x128xf32>
    %c0_13 = arith.constant 0 : index
    %c0_14 = arith.constant 0 : index
    %18 = vector.load %arg6[%c0_13, %c0_14] : memref<128x128xbf16, #tpu.memory_space<vmem>>, vector<128x128xbf16>
    %cst_15 = arith.constant dense<0.000000e+00> : vector<8x128xf32>
    %19 = tpu.matmul %1, %18, %cst_15 {dimension_numbers = #tpu.dot_dimension_numbers<[1], [0], [0], [1], [0, 0, 1, 1], [], []>} : vector<8x128xbf16>, vector<128x128xbf16>, vector<8x128xf32> -> vector<8x128xf32>
    %20 = arith.truncf %17 : vector<8x128xf32> to vector<8x128xbf16>
    %c0_16 = arith.constant 0 : index
    %c0_17 = arith.constant 0 : index
    %21 = vector.load %arg7[%c0_16, %c0_17] : memref<128x128xbf16, #tpu.memory_space<vmem>>, vector<128x128xbf16>
    %cst_18 = arith.constant dense<0.000000e+00> : vector<8x128xf32>
    %22 = tpu.matmul %20, %21, %cst_18 {dimension_numbers = #tpu.dot_dimension_numbers<[1], [0], [0], [1], [0, 0, 1, 1], [], []>} : vector<8x128xbf16>, vector<128x128xbf16>, vector<8x128xf32> -> vector<8x128xf32>
    %23 = arith.addf %19, %22 : vector<8x128xf32>
    %c0_19 = arith.constant 0 : index
    %c0_20 = arith.constant 0 : index
    %24 = vector.load %arg8[%c0_19, %c0_20] : memref<1x128xf32, #tpu.memory_space<vmem>>, vector<1x128xf32>
    %25 = vector.broadcast %24 : vector<1x128xf32> to vector<8x128xf32>
    %26 = arith.addf %23, %25 : vector<8x128xf32>
    %cst_21 = arith.constant 0.000000e+00 : f32
    %27 = vector.broadcast %cst_21 : f32 to vector<8x128xf32>
    %28 = arith.cmpf ogt, %26, %27 : vector<8x128xf32>
    %cst_22 = arith.constant 0.00999999977 : f32
    %29 = vector.broadcast %cst_22 : f32 to vector<8x128xf32>
    %30 = arith.mulf %29, %26 : vector<8x128xf32>
    %31 = arith.select %28, %26, %30 : vector<8x128xi1>, vector<8x128xf32>
    %32 = arith.truncf %31 : vector<8x128xf32> to vector<8x128xbf16>
    %c0_23 = arith.constant 0 : index
    %c0_24 = arith.constant 0 : index
    %33 = vector.load %arg9[%c0_23, %c0_24] : memref<128x128xbf16, #tpu.memory_space<vmem>>, vector<128x128xbf16>
    %cst_25 = arith.constant dense<0.000000e+00> : vector<8x128xf32>
    %34 = tpu.matmul %32, %33, %cst_25 {dimension_numbers = #tpu.dot_dimension_numbers<[1], [0], [0], [1], [0, 0, 1, 1], [], []>} : vector<8x128xbf16>, vector<128x128xbf16>, vector<8x128xf32> -> vector<8x128xf32>
    %c0_26 = arith.constant 0 : index
    %c0_27 = arith.constant 0 : index
    %35 = vector.load %arg10[%c0_26, %c0_27] : memref<1x128xf32, #tpu.memory_space<vmem>>, vector<1x128xf32>
    %36 = vector.broadcast %35 : vector<1x128xf32> to vector<8x128xf32>
    %37 = arith.addf %34, %36 : vector<8x128xf32>
    %38 = arith.negf %37 : vector<8x128xf32>
    %39 = math.exp %38 : vector<8x128xf32>
    %cst_28 = arith.constant 1.000000e+00 : f32
    %40 = vector.broadcast %cst_28 : f32 to vector<8x128xf32>
    %41 = arith.addf %40, %39 : vector<8x128xf32>
    %42 = arith.divf %40, %41 : vector<8x128xf32>
    %c0_29 = arith.constant 0 : index
    %c0_30 = arith.constant 0 : index
    %43 = vector.load %arg11[%c0_29, %c0_30] : memref<8x128xf32, #tpu.memory_space<vmem>>, vector<8x128xf32>
    tpu.vector_store %arg11[%c0_29, %c0_30], %42 {strides = array<i32>} : memref<8x128xf32, #tpu.memory_space<vmem>>, vector<8x128xf32>,
    return
  }
  func.func @transform_0(%arg0: i32) -> (i32, i32) {
    %c0_i32 = arith.constant 0 : i32
    %c0_i32_0 = arith.constant 0 : i32
    return %arg0, %c0_i32 : i32, i32
  }
  func.func @transform_1(%arg0: i32) -> (i32, i32) {
    %c0_i32 = arith.constant 0 : i32
    %c0_i32_0 = arith.constant 0 : i32
    %c0_i32_1 = arith.constant 0 : i32
    return %c0_i32, %c0_i32_0 : i32, i32
  }
  func.func @transform_2(%arg0: i32) -> (i32, i32) {
    %c0_i32 = arith.constant 0 : i32
    %c0_i32_0 = arith.constant 0 : i32
    %c0_i32_1 = arith.constant 0 : i32
    return %c0_i32, %c0_i32_0 : i32, i32
  }
  func.func @transform_3(%arg0: i32) -> (i32, i32) {
    %c0_i32 = arith.constant 0 : i32
    %c0_i32_0 = arith.constant 0 : i32
    %c0_i32_1 = arith.constant 0 : i32
    return %c0_i32, %c0_i32_0 : i32, i32
  }
  func.func @transform_4(%arg0: i32) -> (i32, i32) {
    %c0_i32 = arith.constant 0 : i32
    %c0_i32_0 = arith.constant 0 : i32
    %c0_i32_1 = arith.constant 0 : i32
    return %c0_i32, %c0_i32_0 : i32, i32
  }
  func.func @transform_5(%arg0: i32) -> (i32, i32) {
    %c0_i32 = arith.constant 0 : i32
    %c0_i32_0 = arith.constant 0 : i32
    %c0_i32_1 = arith.constant 0 : i32
    return %c0_i32, %c0_i32_0 : i32, i32
  }
  func.func @transform_6(%arg0: i32) -> (i32, i32) {
    %c0_i32 = arith.constant 0 : i32
    %c0_i32_0 = arith.constant 0 : i32
    %c0_i32_1 = arith.constant 0 : i32
    return %c0_i32, %c0_i32_0 : i32, i32
  }
  func.func @transform_7(%arg0: i32) -> (i32, i32) {
    %c0_i32 = arith.constant 0 : i32
    %c0_i32_0 = arith.constant 0 : i32
    %c0_i32_1 = arith.constant 0 : i32
    return %c0_i32, %c0_i32_0 : i32, i32
  }
  func.func @transform_8(%arg0: i32) -> (i32, i32) {
    %c0_i32 = arith.constant 0 : i32
    %c0_i32_0 = arith.constant 0 : i32
    %c0_i32_1 = arith.constant 0 : i32
    return %c0_i32, %c0_i32_0 : i32, i32
  }
  func.func @transform_9(%arg0: i32) -> (i32, i32) {
    %c0_i32 = arith.constant 0 : i32
    %c0_i32_0 = arith.constant 0 : i32
    %c0_i32_1 = arith.constant 0 : i32
    return %c0_i32, %c0_i32_0 : i32, i32
  }
  func.func @transform_10(%arg0: i32) -> (i32, i32) {
    %c0_i32 = arith.constant 0 : i32
    %c0_i32_0 = arith.constant 0 : i32
    return %arg0, %c0_i32 : i32, i32
  }
}

</mosaic_0001>

<bundles_post_ra>
// kernel: tpu_custom_call.1
= control target key start
LH: loop header
LB: loop body
LE: loop exit
PB: predicated region body
PF: predicated region fallthrough
CT: control target
= control target key end

     0   :  { %15 = vsyncpa [#allocation3], 0  ;;  %s1708_s0 = inlined_call_operand.hbm [shape: f32[8,128], index: 0, kind: input, shape index: {}]   ;;  %s1709_s1 = inlined_call_operand.hbm [shape: bf16[128,256], index: 1, kind: input, shape index: {}]   ;;  %s1710_s2 = inlined_call_operand.hbm [shape: bf16[128,256], index: 2, kind: input, shape index: {}]   ;;  %s1711_s3 = inlined_call_operand.hbm [shape: bf16[256,128], index: 3, kind: input, shape index: {}]   ;;  %s1712_s4 = inlined_call_operand.hbm [shape: bf16[128,128], index: 4, kind: input, shape index: {}]   ;;  %s1713_s5 = inlined_call_operand.hbm [shape: bf16[128,128], index: 5, kind: input, shape index: {}]   ;;  %s1714_s6 = inlined_call_operand.hbm [shape: bf16[128,128], index: 6, kind: input, shape index: {}]   ;;  %s1715_s7 = inlined_call_operand.vmem [shape: f32[1,128], index: 7, kind: input, shape index: {}]   ;;  %s1716_s8 = inlined_call_operand.hbm [shape: bf16[128,128], index: 8, kind: input, shape index: {}]   ;;  %s1717_s9 = inlined_call_operand.vmem [shape: f32[1,128], index: 9, kind: input, shape index: {}]   ;;  %s1718_s10 = inlined_call_operand.hbm [shape: f32[8,128], index: 10, kind: output, shape index: {}]  }
   0x1   :  { %16 = vsyncpa [#allocation6], 0 }
   0x2   :  { %17 = vsyncpa [#allocation9], 0 }
   0x3   :  { %18 = vsyncpa [#allocation12], 0 }
   0x4   :  { %19 = vsyncpa [#allocation15], 0  ;;  %s36_s15 = sshll.u32 %s1709_s1, 4  ;;  %s37_s15 = int_to_ptr.hbm [resolvable:$true] %s36_s15 }
   0x5   :  { %20 = vsyncpa [#allocation4], 0  ;;  %s1580_s16 = smov [#allocation5]   ;;  %s62_s20 = sshll.u32 %s1711_s3, 4  ;;  %s63_s20 = int_to_ptr.hbm [resolvable:$true] %s62_s20 }
   0x6   :  { %s38_s17 = sshll.u32 %s1580_s16, 4  ;;  %s1581_s21 = smov 128   ;;  %s39_s17 = int_to_ptr.vmem [resolvable:$true] %s38_s17 }
   0x7   :  { %s1582_s22 = smov 8   ;;  %s1583_s23 = smov [#allocation8]  }
   0x8   :  { %44 = dma.hbm_to_vmem [thread:$0]  %s37_s15, 2048, %s39_s17, [#allocation6], %s1581_s21, %s1581_s21, %s1582_s22  }
   0x9   :  { %s64_s24 = sshll.u32 %s1583_s23, 4  ;;  %s1584_s1 = smov 64   ;;  %s65_s24 = int_to_ptr.vmem [resolvable:$true] %s64_s24 }
   0xa   :  { %s1585_s25 = smov 4   ;;  %s88_s3 = sshll.u32 %s1713_s5, 4  ;;  %s89_s3 = int_to_ptr.hbm [resolvable:$true] %s88_s3 }
   0xb   :  { %70 = dma.hbm_to_vmem [thread:$0]  %s63_s20, 2048, %s65_s24, [#allocation9], %s1584_s1, %s1584_s1, %s1585_s25  }
   0xc   :  { %s1586_s28 = smov [#allocation11]   ;;  %s26_s12 = sshll.u32 %s1708_s0, 4  ;;  %s27_s12 = int_to_ptr.hbm [resolvable:$true] %s26_s12 }
   0xd   :  { %s90_s29 = sshll.u32 %s1586_s28, 4  ;;  %s1587_s13 = smov [#allocation2]   ;;  %s91_s29 = int_to_ptr.vmem [resolvable:$true] %s90_s29 }
   0xe   :  { %96 = dma.hbm_to_vmem [thread:$0]  %s89_s3, 1024, %s91_s29, [#allocation12], %s1584_s1, %s1584_s1, %s1585_s25  }
   0xf   :  { %s28_s14 = sshll.u32 %s1587_s13, 4  ;;  %s49_s17 = sshll.u32 %s1710_s2, 4  ;;  %s29_s14 = int_to_ptr.vmem [resolvable:$true] %s28_s14  ;;  %s50_s17 = int_to_ptr.hbm [resolvable:$true] %s49_s17 }
  0x10   :  { %31 = dma.hbm_to_vmem [thread:$0]  %s27_s12, 128, %s29_s14, [#allocation3]  }
  0x11   :  { %s75_s19 = sshll.u32 %s1712_s4, 4  ;;  %s1588_s20 = smov [#allocation7]   ;;  %s76_s19 = int_to_ptr.hbm [resolvable:$true] %s75_s19 }
  0x12   :  { %s51_s0 = sshll.u32 %s1588_s20, 4  ;;  %s1589_s23 = smov [#allocation10]   ;;  %s52_s0 = int_to_ptr.vmem [resolvable:$true] %s51_s0 }
  0x13   :  { %57 = dma.hbm_to_vmem [thread:$0]  %s50_s17, 2048, %s52_s0, [#allocation6], %s1581_s21, %s1581_s21, %s1582_s22  }
  0x14   :  { %s77_s24 = sshll.u32 %s1589_s23, 4  ;;  %s101_s2 = sshll.u32 %s1714_s6, 4  ;;  %s78_s24 = int_to_ptr.vmem [resolvable:$true] %s77_s24  ;;  %s102_s2 = int_to_ptr.hbm [resolvable:$true] %s101_s2 }
  0x15   :  { %83 = dma.hbm_to_vmem [thread:$0]  %s76_s19, 1024, %s78_s24, [#allocation9], %s1584_s1, %s1584_s1, %s1585_s25  }
  0x16   :  { %s116_s28 = sshll.u32 %s1716_s8, 4  ;;  %s1590_s29 = smov [#allocation13]   ;;  %s117_s28 = int_to_ptr.hbm [resolvable:$true] %s116_s28 }
  0x17   :  { %s103_s30 = sshll.u32 %s1590_s29, 4  ;;  %s1591_s21 = smov [#allocation14]   ;;  %s104_s30 = int_to_ptr.vmem [resolvable:$true] %s103_s30 }
  0x18   :  { %109 = dma.hbm_to_vmem [thread:$0]  %s102_s2, 1024, %s104_s30, [#allocation12], %s1584_s1, %s1584_s1, %s1585_s25  }
  0x19   :  { %s118_s6 = sshll.u32 %s1591_s21, 4  ;;  %s119_s6 = int_to_ptr.vmem [resolvable:$true] %s118_s6 }
  0x1a   :  { %124 = dma.hbm_to_vmem [thread:$0]  %s117_s28, 1024, %s119_s6, [#allocation15], %s1584_s1, %s1584_s1, %s1585_s25  }
  0x1b   :  { %1568 = dma.done.wait [#allocation3], 128  }
  0x1c   :  { %1569 = vsyncadd [#allocation3], 4294967168 }
  0x1d   :  { %1570 = dma.done.wait [#allocation6], 4096  }
  0x1e   :  { %1571 = vsyncadd [#allocation6], 4294963200 }
  0x1f   :  { %1572 = dma.done.wait [#allocation9], 3072  }
  0x20   :  { %1573 = vsyncadd [#allocation9], 4294964224 }
  0x21   :  { %1574 = dma.done.wait [#allocation12], 2048  }
  0x22   :  { %1575 = vsyncadd [#allocation12], 4294965248 }
  0x23   :  { %1576 = dma.done.wait [#allocation15], 1024  }
  0x24   :  { %1577 = vsyncadd [#allocation15], 4294966272  ;;  %v990_v0 = vld [vmem:[#allocation5 + $0x70] sm:$0xf]  ;;  %v1268_v1 = vld [vmem:[#allocation5 + $0x74] sm:$0xf0] }
  0x25   :  { %v1267_v2 = vld [vmem:[#allocation5 + $0x74] sm:$0xf]  ;;  %v991_v3 = vor.u32 %v1268_v1, %v990_v0  ;;  %v992_v4 = vld [vmem:[#allocation5 + $0x78] sm:$0xf0]  ;;  %v1054_v5 = vld [vmem:[#allocation7 + $0x70] sm:$0xf] }
  0x26   :  { %v1284_v6 = vld [vmem:[#allocation7 + $0x74] sm:$0xf0]  ;;  %v995_v7 = vor.u32 %v1267_v2, %v992_v4  ;;  %v1283_v9 = vld [vmem:[#allocation7 + $0x74] sm:$0xf]  ;;  %v1056_v10 = vld [vmem:[#allocation7 + $0x78] sm:$0xf0] }
  0x27   :  { %v1055_v8 = vor.u32 %v1284_v6, %v1054_v5  ;;  %v982_v11 = vld [vmem:[#allocation5 + $0x60] sm:$0xf]  ;;  %259 = vmatpush.bf16.msra.mxu0 %v991_v3  ;;  %v1059_v12 = vor.u32 %v1283_v9, %v1056_v10  ;;  %v1266_v13 = vld [vmem:[#allocation5 + $0x64] sm:$0xf0]  ;;  %v1265_v14 = vld [vmem:[#allocation5 + $0x64] sm:$0xf] }
  0x28   :  { %v984_v15 = vld [vmem:[#allocation5 + $0x68] sm:$0xf0]  ;;  %272 = vmatpush.bf16.msra.mxu1 %v995_v7  ;;  %v983_v16 = vor.u32 %v1266_v13, %v982_v11  ;;  %v1046_v18 = vld [vmem:[#allocation7 + $0x60] sm:$0xf]  ;;  %v1282_v19 = vld [vmem:[#allocation7 + $0x64] sm:$0xf0] }
  0x29   :  { %381 = vmatpush.bf16.msra.mxu2 %v1055_v8  ;;  %v987_v17 = vor.u32 %v1265_v14, %v984_v15  ;;  %v1281_v20 = vld [vmem:[#allocation7 + $0x64] sm:$0xf]  ;;  %394 = vmatpush.bf16.msra.mxu3 %v1059_v12  ;;  %v1047_v21 = vor.u32 %v1282_v19, %v1046_v18  ;;  %v1048_v22 = vld [vmem:[#allocation7 + $0x68] sm:$0xf0]  ;;  %v974_v23 = vld [vmem:[#allocation5 + $0x50] sm:$0xf] }
  0x2a   :  { %v1264_v24 = vld [vmem:[#allocation5 + $0x54] sm:$0xf0]  ;;  %v1051_v25 = vor.u32 %v1281_v20, %v1048_v22  ;;  %v1263_v26 = vld [vmem:[#allocation5 + $0x54] sm:$0xf]  ;;  %v976_v27 = vld [vmem:[#allocation5 + $0x58] sm:$0xf0] }
  0x2b   :  { %v1038_v28 = vld [vmem:[#allocation7 + $0x50] sm:$0xf]  ;;  %260 = vmatpush.bf16.msra.mxu0 %v983_v16  ;;  %v975_v29 = vor.u32 %v1264_v24, %v974_v23  ;;  %v1280_v30 = vld [vmem:[#allocation7 + $0x54] sm:$0xf0]  ;;  %v1279_v31 = vld [vmem:[#allocation7 + $0x54] sm:$0xf]  ;;  %v979_v33 = vor.u32 %v1263_v26, %v976_v27 }
  0x2c   :  { %v1040_v32 = vld [vmem:[#allocation7 + $0x58] sm:$0xf0]  ;;  %273 = vmatpush.bf16.msra.mxu1 %v987_v17  ;;  %v1039_v34 = vor.u32 %v1280_v30, %v1038_v28  ;;  %v966_v35 = vld [vmem:[#allocation5 + $0x40] sm:$0xf]  ;;  %v1262_v36 = vld [vmem:[#allocation5 + $0x44] sm:$0xf0] }
  0x2d   :  { %382 = vmatpush.bf16.msra.mxu2 %v1047_v21  ;;  %v1261_v37 = vld [vmem:[#allocation5 + $0x44] sm:$0xf]  ;;  %395 = vmatpush.bf16.msra.mxu3 %v1051_v25  ;;  %v1043_v38 = vor.u32 %v1279_v31, %v1040_v32  ;;  %v968_v39 = vld [vmem:[#allocation5 + $0x48] sm:$0xf0]  ;;  %v1030_v40 = vld [vmem:[#allocation7 + $0x40] sm:$0xf]  ;;  %v967_v44 = vor.u32 %v1262_v36, %v966_v35 }
  0x2e   :  { %v1278_v41 = vld [vmem:[#allocation7 + $0x44] sm:$0xf0]  ;;  %v1277_v42 = vld [vmem:[#allocation7 + $0x44] sm:$0xf]  ;;  %v1032_v43 = vld [vmem:[#allocation7 + $0x48] sm:$0xf0]  ;;  %v971_v45 = vor.u32 %v1261_v37, %v968_v39 }
  0x2f   :  { %261 = vmatpush.bf16.msra.mxu0 %v975_v29  ;;  %v1031_v46 = vor.u32 %v1278_v41, %v1030_v40  ;;  %v958_v47 = vld [vmem:[#allocation5 + $0x30] sm:$0xf]  ;;  %v1260_v48 = vld [vmem:[#allocation5 + $0x34] sm:$0xf0]  ;;  %v1259_v49 = vld [vmem:[#allocation5 + $0x34] sm:$0xf]  ;;  %v1035_v50 = vor.u32 %v1277_v42, %v1032_v43 }
  0x30   :  { %274 = vmatpush.bf16.msra.mxu1 %v979_v33  ;;  %v960_v51 = vld [vmem:[#allocation5 + $0x38] sm:$0xf0]  ;;  %v1022_v52 = vld [vmem:[#allocation7 + $0x30] sm:$0xf]  ;;  %v1276_v53 = vld [vmem:[#allocation7 + $0x34] sm:$0xf0]  ;;  %v959_v56 = vor.u32 %v1260_v48, %v958_v47 }
  0x31   :  { %383 = vmatpush.bf16.msra.mxu2 %v1039_v34  ;;  %396 = vmatpush.bf16.msra.mxu3 %v1043_v38  ;;  %v1275_v54 = vld [vmem:[#allocation7 + $0x34] sm:$0xf]  ;;  %v1024_v55 = vld [vmem:[#allocation7 + $0x38] sm:$0xf0]  ;;  %v963_v57 = vor.u32 %v1259_v49, %v960_v51  ;;  %v1023_v58 = vor.u32 %v1276_v53, %v1022_v52  ;;  %v950_v59 = vld [vmem:[#allocation5 + $0x20] sm:$0xf] }
  0x32   :  { %v1258_v60 = vld [vmem:[#allocation5 + $0x24] sm:$0xf0]  ;;  %v1257_v61 = vld [vmem:[#allocation5 + $0x24] sm:$0xf]  ;;  %v1027_v62 = vor.u32 %v1275_v54, %v1024_v55  ;;  %v952_v63 = vld [vmem:[#allocation5 + $0x28] sm:$0xf0] }
  0x33   :  { %262 = vmatpush.bf16.msra.mxu0 %v967_v44  ;;  %v1014_v0 = vld [vmem:[#allocation7 + $0x20] sm:$0xf]  ;;  %v1274_v1 = vld [vmem:[#allocation7 + $0x24] sm:$0xf0]  ;;  %v1273_v2 = vld [vmem:[#allocation7 + $0x24] sm:$0xf]  ;;  %v951_v4 = vor.u32 %v1258_v60, %v950_v59  ;;  %v955_v5 = vor.u32 %v1257_v61, %v952_v63 }
  0x34   :  { %275 = vmatpush.bf16.msra.mxu1 %v971_v45  ;;  %v1016_v3 = vld [vmem:[#allocation7 + $0x28] sm:$0xf0]  ;;  %v1015_v6 = vor.u32 %v1274_v1, %v1014_v0  ;;  %v942_v7 = vld [vmem:[#allocation5 + $0x10] sm:$0xf]  ;;  %v1256_v8 = vld [vmem:[#allocation5 + $0x14] sm:$0xf0] }
  0x35   :  { %384 = vmatpush.bf16.msra.mxu2 %v1031_v46  ;;  %397 = vmatpush.bf16.msra.mxu3 %v1035_v50  ;;  %v1255_v9 = vld [vmem:[#allocation5 + $0x14] sm:$0xf]  ;;  %v1019_v10 = vor.u32 %v1273_v2, %v1016_v3  ;;  %v944_v11 = vld [vmem:[#allocation5 + $0x18] sm:$0xf0]  ;;  %v1006_v12 = vld [vmem:[#allocation7 + $0x10] sm:$0xf]  ;;  %v943_v16 = vor.u32 %v1256_v8, %v942_v7 }
  0x36   :  { %v1272_v13 = vld [vmem:[#allocation7 + $0x14] sm:$0xf0]  ;;  %v1271_v14 = vld [vmem:[#allocation7 + $0x14] sm:$0xf]  ;;  %v1008_v15 = vld [vmem:[#allocation7 + $0x18] sm:$0xf0]  ;;  %v947_v18 = vor.u32 %v1255_v9, %v944_v11 }
  0x37   :  { %263 = vmatpush.bf16.msra.mxu0 %v959_v56  ;;  %v934_v17 = vld [vmem:[#allocation5] sm:$0xf]  ;;  %v1007_v19 = vor.u32 %v1272_v13, %v1006_v12  ;;  %v1254_v20 = vld [vmem:[#allocation5 + $0x4] sm:$0xf0]  ;;  %v1253_v21 = vld [vmem:[#allocation5 + $0x4] sm:$0xf]  ;;  %v1011_v23 = vor.u32 %v1271_v14, %v1008_v15 }
  0x38   :  { %276 = vmatpush.bf16.msra.mxu1 %v963_v57  ;;  %v159_v22 = vld [vmem:[#allocation2] sm:$0xff]  ;;  %v936_v24 = vld [vmem:[#allocation5 + $0x8] sm:$0xf0]  ;;  %v998_v25 = vld [vmem:[#allocation7] sm:$0xf]  ;;  %v935_v29 = vor.u32 %v1254_v20, %v934_v17 }
  0x39   :  { %385 = vmatpush.bf16.msra.mxu2 %v1023_v58  ;;  %398 = vmatpush.bf16.msra.mxu3 %v1027_v62  ;;  %v1270_v26 = vld [vmem:[#allocation7 + $0x4] sm:$0xf0]  ;;  %v1269_v27 = vld [vmem:[#allocation7 + $0x4] sm:$0xf]  ;;  %v1000_v28 = vld [vmem:[#allocation7 + $0x8] sm:$0xf0]  ;;  %v161_v30 = vmul.f32 %v159_v22, %v159_v22  ;;  %v939_v31 = vor.u32 %v1253_v21, %v936_v24  ;;  %v1693_v35 = vpack.c.bf16 %v159_v22, %v159_v22 }
  0x3a   :  { %v999_v32 = vor.u32 %v1270_v26, %v998_v25  ;;  %v1003_v33 = vor.u32 %v1269_v27, %v1000_v28  ;;  %v1308_v34 = vld [vmem:[#allocation10 + $0x38] sm:$0xff]  ;;  %v1307_v39 = vld [vmem:[#allocation10 + $0x30] sm:$0xff]  ;;  %v1306_v42 = vld [vmem:[#allocation10 + $0x28] sm:$0xff] }
  0x3b   :  { %264 = vmatpush.bf16.msra.mxu0 %v951_v4  ;;  %v1300_v36 = vld [vmem:[#allocation8 + $0x78] sm:$0xff]  ;;  %v162_v37 = vpack.c.bf16 %v161_v30, %v161_v30  ;;  %v1299_v40 = vld [vmem:[#allocation8 + $0x70] sm:$0xff]  ;;  %v1298_v43 = vld [vmem:[#allocation8 + $0x68] sm:$0xff] }
  0x3c   :  { %277 = vmatpush.bf16.msra.mxu1 %v955_v5  ;;  %v1292_v38 = vld [vmem:[#allocation8 + $0x38] sm:$0xff]  ;;  %v1291_v41 = vld [vmem:[#allocation8 + $0x30] sm:$0xff]  ;;  %v1290_v44 = vld [vmem:[#allocation8 + $0x28] sm:$0xff] }
  0x3d   :  { %386 = vmatpush.bf16.msra.mxu2 %v1015_v6  ;;  %399 = vmatpush.bf16.msra.mxu3 %v1019_v10  ;;  %v1305_v45 = vld [vmem:[#allocation10 + $0x20] sm:$0xff]  ;;  %v1304_v48 = vld [vmem:[#allocation10 + $0x18] sm:$0xff]  ;;  %v1303_v51 = vld [vmem:[#allocation10 + $0x10] sm:$0xff] }
  0x3e   :  { %v1297_v46 = vld [vmem:[#allocation8 + $0x60] sm:$0xff]  ;;  %v1296_v49 = vld [vmem:[#allocation8 + $0x58] sm:$0xff]  ;;  %v1302_v52 = vld [vmem:[#allocation10 + $0x8] sm:$0xff] }
  0x3f   :  { %265 = vmatpush.bf16.msra.mxu0 %v943_v16  ;;  %v1289_v47 = vld [vmem:[#allocation8 + $0x20] sm:$0xff]  ;;  %v1288_v50 = vld [vmem:[#allocation8 + $0x18] sm:$0xff]  ;;  %v1287_v54 = vld [vmem:[#allocation8 + $0x10] sm:$0xff] }
  0x40   :  { %278 = vmatpush.bf16.msra.mxu1 %v947_v18  ;;  %v1301_v53 = vld [vmem:[#allocation10] sm:$0xff]  ;;  %v1295_v55 = vld [vmem:[#allocation8 + $0x50] sm:$0xff]  ;;  %v1286_v56 = vld [vmem:[#allocation8 + $0x8] sm:$0xff] }
  0x41   :  { %387 = vmatpush.bf16.msra.mxu2 %v1007_v19  ;;  %400 = vmatpush.bf16.msra.mxu3 %v1011_v23  ;;  %v1294_v57 = vld [vmem:[#allocation8 + $0x48] sm:$0xff]  ;;  %v1285_v58 = vld [vmem:[#allocation8] sm:$0xff]  ;;  %v1316_v60 = vld [vmem:[#allocation11 + $0x38] sm:$0xff] }
  0x42   :  { %v1293_v59 = vld [vmem:[#allocation8 + $0x40] sm:$0xff]  ;;  %v1324_v61 = vld [vmem:[#allocation13 + $0x38] sm:$0xff]  ;;  %v1315_v62 = vld [vmem:[#allocation11 + $0x30] sm:$0xff] }
  0x43   :  { %266 = vmatpush.bf16.msra.mxu0 %v935_v29  ;;  %v1323_v63 = vld [vmem:[#allocation13 + $0x30] sm:$0xff]  ;;  %v1314_v0 = vld [vmem:[#allocation11 + $0x28] sm:$0xff]  ;;  %v1313_v2 = vld [vmem:[#allocation11 + $0x20] sm:$0xff] }
  0x44   :  { %279 = vmatpush.bf16.msra.mxu1 %v939_v31  ;;  %v1322_v1 = vld [vmem:[#allocation13 + $0x28] sm:$0xff]  ;;  %v1321_v3 = vld [vmem:[#allocation13 + $0x20] sm:$0xff]  ;;  %v1312_v4 = vld [vmem:[#allocation11 + $0x18] sm:$0xff] }
  0x45   :  { %388 = vmatpush.bf16.msra.mxu2 %v999_v32  ;;  %401 = vmatpush.bf16.msra.mxu3 %v1003_v33  ;;  %v1320_v5 = vld [vmem:[#allocation13 + $0x18] sm:$0xff]  ;;  %v1311_v9 = vld [vmem:[#allocation11 + $0x10] sm:$0xff]  ;;  %v1310_v24 = vld [vmem:[#allocation11 + $0x8] sm:$0xff] }
  0x46   :  { %267 = vmatmul.bf16.vlgmr.msra.gmra.mxu0 %v1693_v35  ;;  %v1319_v10 = vld [vmem:[#allocation13 + $0x10] sm:$0xff]  ;;  %v1318_v25 = vld [vmem:[#allocation13 + $0x8] sm:$0xff]  ;;  %v1309_v26 = vld [vmem:[#allocation11] sm:$0xff] }
  0x47   :  { %280 = vmatmul.bf16.vlgmr.msra.gmra.mxu1 %v1693_v35  ;;  %541 = vmatpush.bf16.msrb.mxu0 %v1292_v38  ;;  %v1317_v27 = vld [vmem:[#allocation13] sm:$0xff]  ;;  %v1332_v28 = vld [vmem:[#allocation14 + $0x38] sm:$0xff]  ;;  %v1331_v29 = vld [vmem:[#allocation14 + $0x30] sm:$0xff] }
  0x48   :  { %554 = vmatpush.bf16.msrb.mxu1 %v1300_v36  ;;  %389 = vmatmul.bf16.vlgmr.msra.gmra.mxu2 %v162_v37  ;;  %v1330_v30 = vld [vmem:[#allocation14 + $0x28] sm:$0xff]  ;;  %v1329_v31 = vld [vmem:[#allocation14 + $0x20] sm:$0xff] }
  0x49   :  { %632 = vmatpush.bf16.msrb.mxu2 %v1308_v34  ;;  %402 = vmatmul.bf16.vlgmr.msra.gmra.mxu3 %v162_v37 }
  0x4a   :  { %727 = vmatpush.bf16.msrb.mxu3 %v1324_v61 }
  0x4b   :  { %542 = vmatpush.bf16.msrb.mxu0 %v1291_v41  ;;  %v1328_v41 = vld [vmem:[#allocation14 + $0x18] sm:$0xff] }
  0x4c   :  { %555 = vmatpush.bf16.msrb.mxu1 %v1299_v40 }
  0x4d   :  { %633 = vmatpush.bf16.msrb.mxu2 %v1307_v39 }
  0x4e   :  { %728 = vmatpush.bf16.msrb.mxu3 %v1323_v63 }
  0x4f   :  { %543 = vmatpush.bf16.msrb.mxu0 %v1290_v44  ;;  %v1326_v44 = vld [vmem:[#allocation14 + $0x8] sm:$0xff] }
  0x50   :  { %556 = vmatpush.bf16.msrb.mxu1 %v1298_v43 }
  0x51   :  { %634 = vmatpush.bf16.msrb.mxu2 %v1306_v42 }
  0x52   :  { %729 = vmatpush.bf16.msrb.mxu3 %v1322_v1 }
  0x53   :  { %544 = vmatpush.bf16.msrb.mxu0 %v1289_v47 }
  0x54   :  { %557 = vmatpush.bf16.msrb.mxu1 %v1297_v46  ;;  %v1346_v46 = vld [vmem:[%s1715_s7] ss:$0 sm:$0xff]  ;;  %s1592_s7 = smov [#allocation16]  }
  0x55   :  { %635 = vmatpush.bf16.msrb.mxu2 %v1305_v45  ;;  %v1325_v45 = vld [vmem:[#allocation14] sm:$0xff]  ;;  %s916_s11 = sshll.u32 %s1592_s7, 4  ;;  %s917_s11 = int_to_ptr.vmem [resolvable:$true] %s916_s11 }
  0x56   :  { %730 = vmatpush.bf16.msrb.mxu3 %v1321_v3 }
  0x57   :  { %545 = vmatpush.bf16.msrb.mxu0 %v1288_v50 }
  0x58   :  { %558 = vmatpush.bf16.msrb.mxu1 %v1296_v49 }
  0x59   :  { %636 = vmatpush.bf16.msrb.mxu2 %v1304_v48 }
  0x5a   :  { %731 = vmatpush.bf16.msrb.mxu3 %v1320_v5 }
  0x5b   :  { %546 = vmatpush.bf16.msrb.mxu0 %v1287_v54  ;;  %v1347_v54 = vld [vmem:[%s1717_s9] ss:$0 sm:$0xff]  ;;  %s918_s9 = sshll.u32 %s1718_s10, 4  ;;  %s919_s9 = int_to_ptr.hbm [resolvable:$true] %s918_s9 }
  0x5c   :  { %559 = vmatpush.bf16.msrb.mxu1 %v1295_v55 }
  0x5d   :  { %637 = vmatpush.bf16.msrb.mxu2 %v1303_v51 }
  0x5e   :  { %732 = vmatpush.bf16.msrb.mxu3 %v1319_v10 }
  0x5f   :  { %547 = vmatpush.bf16.msrb.mxu0 %v1286_v56 }
  0x60   :  { %560 = vmatpush.bf16.msrb.mxu1 %v1294_v57 }
  0x61   :  { %638 = vmatpush.bf16.msrb.mxu2 %v1302_v52 }
  0x62   :  { %733 = vmatpush.bf16.msrb.mxu3 %v1318_v25 }
  0x63   :  { %548 = vmatpush.bf16.msrb.mxu0 %v1285_v58 }
  0x64   :  { %561 = vmatpush.bf16.msrb.mxu1 %v1293_v59 }
  0x65   :  { %639 = vmatpush.bf16.msrb.mxu2 %v1301_v53 }
  0x66   :  { %734 = vmatpush.bf16.msrb.mxu3 %v1317_v27 }
  0x67   :  { %788 = vmatpush.bf16.msra.mxu0 %v1316_v60 }
  0x68   :  { %640 = vmatmul.bf16.vlgmr.msrb.gmra.mxu2 %v1693_v35  ;;  %878 = vmatpush.bf16.msra.mxu1 %v1332_v28 }
  0x6b   :  { %789 = vmatpush.bf16.msra.mxu0 %v1315_v62 }
  0x6c   :  { %879 = vmatpush.bf16.msra.mxu1 %v1331_v29 }
  0x6f   :  { %790 = vmatpush.bf16.msra.mxu0 %v1314_v0 }
  0x70   :  { %880 = vmatpush.bf16.msra.mxu1 %v1330_v30 }
  0x73   :  { %791 = vmatpush.bf16.msra.mxu0 %v1313_v2 }
  0x74   :  { %881 = vmatpush.bf16.msra.mxu1 %v1329_v31 }
  0x77   :  { %792 = vmatpush.bf16.msra.mxu0 %v1312_v4 }
  0x78   :  { %882 = vmatpush.bf16.msra.mxu1 %v1328_v41 }
  0x7b   :  { %793 = vmatpush.bf16.msra.mxu0 %v1311_v9 }
  0x7f   :  { %794 = vmatpush.bf16.msra.mxu0 %v1310_v24 }
  0x83   :  { %795 = vmatpush.bf16.msra.mxu0 %v1309_v26 }
  0xc3   :  { %v268_v6 = vpop.f32.mrf.mxu0 }
  0xc4   :  { %v281_v7 = vpop.f32.mrf.mxu1  ;;  %v407_v8 = vmul.f32 %v268_v6, %v268_v6 }
  0xc5   :  { %v408_v11 = vmul.f32 %v281_v7, %v281_v7 }
  0xcb   :  { %v390_v12 = vpop.f32.mrf.mxu2  ;;  %v270_v15 = vpop.f32.mrf.mxu0 }
  0xcc   :  { %v409_v13 = vsub.f32 %v407_v8, %v390_v12  ;;  %v403_v14 = vpop.f32.mrf.mxu3  ;;  %v283_v17 = vpop.f32.mrf.mxu1 }
  0xcd   :  { %v410_v16 = vsub.f32 %v408_v11, %v403_v14 }
  0xce   :  { %v411_v18 = vpack.c.bf16 %v409_v13, %v409_v13 }
  0xcf   :  { %v412_v19 = vpack.c.bf16 %v410_v16, %v410_v16 }
  0xd0   :  { %549 = vmatmul.bf16.vlgmr.msrb.gmra.mxu0 %v411_v18 }
  0xd1   :  { %562 = vmatmul.bf16.vlgmr.msrb.gmra.mxu1 %v412_v19 }
  0xd3   :  { %v392_v20 = vpop.f32.mrf.mxu2 }
  0xd4   :  { %v405_v21 = vpop.f32.mrf.mxu3 }
  0xe0   :  { %796 = vmatmul.bf16.vlgmr.msra.gmra.mxu0 %v1693_v35  ;;  %v1327_v35 = vld [vmem:[#allocation14 + $0x10] sm:$0xff] }
  0xe1   :  { %883 = vmatpush.bf16.msra.mxu1 %v1327_v35 }
  0xe5   :  { %884 = vmatpush.bf16.msra.mxu1 %v1326_v44 }
  0xe9   :  { %885 = vmatpush.bf16.msra.mxu1 %v1325_v45 }
  0xeb   :  { %v641_v22 = vpop.f32.mrf.mxu2 }
  0xf3   :  { %v643_v23 = vpop.f32.mrf.mxu2 }
 0x14d   :  { %v550_v32 = vpop.f32.mrf.mxu0 }
 0x14e   :  { %v563_v33 = vpop.f32.mrf.mxu1 }
 0x14f   :  { %v564_v34 = vadd.f32 %v563_v33, %v550_v32 }
 0x151   :  { %v567_v36 = vmul.f32 0.5, %v564_v34 }
 0x153   :  { %v645_v37 = vadd.f32 %v641_v22, %v567_v36 }
 0x155   :  { %v662_v38 = vpack.c.bf16 %v645_v37, %v645_v37  ;;  %v552_v39 = vpop.f32.mrf.mxu0 }
 0x156   :  { %v565_v40 = vpop.f32.mrf.mxu1 }
 0x157   :  { %735 = vmatmul.bf16.vlgmr.msrb.gmra.mxu3 %v662_v38 }
 0x15d   :  { %v797_v42 = vpop.f32.mrf.mxu0 }
 0x165   :  { %v799_v43 = vpop.f32.mrf.mxu0 }
 0x1da   :  { %v736_v47 = vpop.f32.mrf.mxu3 }
 0x1db   :  { %v798_v48 = vadd.f32 %v797_v42, %v736_v47 }
 0x1dd   :  { %v805_v49 = vadd.f32 %v1346_v46, %v798_v48 }
 0x1df   :  { %vm806_vm0 = vcmp.gt.f32.partialorder %v805_v49, 0.0  ;;  %v807_v50 = vmul.f32 0.01, %v805_v49 }
 0x1e1   :  { %v808_v51 = vsel %vm806_vm0, %v805_v49, %v807_v50 }
 0x1e2   :  { %v809_v52 = vpack.c.bf16 %v808_v51, %v808_v51  ;;  %v738_v53 = vpop.f32.mrf.mxu3 }
 0x1e4   :  { %886 = vmatmul.bf16.vlgmr.msra.gmra.mxu1 %v809_v52 }
 0x261   :  { %v887_v55 = vpop.f32.mrf.mxu1 }
 0x262   :  { %v888_v56 = vadd.f32 %v1347_v54, %v887_v55 }
 0x264   :  { %v1252_v57 = vmul.f32 -1.442695, %v888_v56 }
 0x266   :  { %1348 = vpow2.f32 %v1252_v57 }
 0x269   :  { %v889_v58 = vpop.f32.mrf.mxu1 }
 0x26c   :  { %v1349_v59 = vpop.eup %1348 }
 0x26d   :  { %v894_v60 = vadd.f32 1.0, %v1349_v59 }
 0x26f   :  { %1350 = vrcp.f32 %v894_v60  ;;  %v906_v0 = vand.u32 2147483648, %v894_v60  ;;  %v904_v2 = vand.u32 2147483647, %v894_v60  ;;  %vm900_vm2 = vweird.f32 %v894_v60 }
 0x271   :  { %v907_v4 = vor.u32 1.1754944e-38, %v906_v0  ;;  %vm905_vm4 = vcmp.eq.f32.partialorder %v904_v2, 8.507059e+37 }
 0x275   :  { %v1351_v61 = vpop.eup %1350 }
 0x276   :  { %v896_v62 = vmul.f32 %v1351_v61, %v894_v60  ;;  %vm901_vm1 = vweird.f32 %v1351_v61 }
 0x277   :  { %vm902_vm3 = vmor %vm900_vm2, %vm901_vm1 }
 0x278   :  { %v897_v63 = vsub.f32 1.0, %v896_v62 }
 0x27a   :  { %v898_v1 = vmul.f32 %v1351_v61, %v897_v63 }
 0x27c   :  { %v899_v3 = vadd.f32 %v1351_v61, %v898_v1 }
 0x27e   :  { %v903_v5 = vsel %vm902_vm3, %v1351_v61, %v899_v3 }
 0x27f   :  { %v908_v6 = vsel %vm905_vm4, %v907_v4, %v903_v5 }
 0x280   :  { %910 = vst [vmem:[#allocation16] sm:$0xff] %v908_v6 }
 0x281   :  { %921 = dma.vmem_to_hbm [thread:$0]  %s917_s11, 128, %s919_s9, [#allocation4]  }
 0x282   :  { %1578 = dma.done.wait [#allocation4], 128  }
 0x283   :  { %1579 = vsyncadd [#allocation4], 4294967168 }
 0x284   :  { %926 = vsyncpa [#allocation3], 1 }
 0x285   :  { %927 = vsyncpa [#allocation6], 1 }
 0x286   :  { %928 = vsyncpa [#allocation9], 1 }
 0x287   :  { %929 = vsyncpa [#allocation12], 1 }
 0x288   :  { %930 = vsyncpa [#allocation15], 1 }
 0x289   :  { %931 = vsyncpa [#allocation4], 1 }

</bundles_post_ra>
